<compile_context>
chip_gen: v7x
topology: tpu7x:2x2x1
jax: 0.10.0
libtpu: 0.0.40
codegen_flags: <defaults>
</compile_context>

<pallas_src>
import functools

import jax
import jax.numpy as jnp
from jax.experimental import pallas as pl
from jax.experimental.pallas import tpu as pltpu


def _round_up(x: int, m: int) -> int:
    return ((x + m - 1) // m) * m


def _cdiv(a: int, b: int) -> int:
    return (a + b - 1) // b


def _corr2d_kernel(w_ref, b_ref, xa_ref, xh_ref, o_ref, edge_ref, *, kh, kw):
    # w_ref:    (kh*kw,) f32 SMEM  -- flattened kernel taps
    # b_ref:    (1,)     f32 SMEM  -- bias
    # xa_ref:   (tm,   c_pad) VMEM -- main input rows of this output tile
    # xh_ref:   (halo, c_pad) VMEM -- row halo just below the tile
    # o_ref:    (tm, ow_pad)  VMEM -- lane-dense output tile (ow_pad % 128 == 0)
    # edge_ref: (2*halo, c_pad) f32 VMEM scratch -- boundary band only (no full slab)
    tm, ow_pad = o_ref.shape
    halo = xh_ref.shape[0]
    top = tm - halo                      # rows computed purely from xa_ref

    # Read every scalar out of SMEM before any vector work.
    w = [w_ref[t] for t in range(kh * kw)]
    bias = b_ref[0]

    # Stage only the boundary band: last `halo` rows of the tile + the halo rows.
    # Two small, fully aligned stores (halo % 8 == 0, c_pad % 128 == 0).
    edge_ref[0:halo, :] = xa_ref[top:tm, :]
    edge_ref[halo:2 * halo, :] = xh_ref[...]

    def window_sum(src_ref, n_rows):
        # Output rows [0, n_rows) relative to src_ref row 0; src_ref must hold
        # window rows [0, n_rows + kh - 1).
        total = None
        for di in range(kh):
            v = src_ref[di:di + n_rows, :]          # one load per kernel row
            acc = v * w[di * kw]
            if di == 0:
                acc = acc + bias                    # bias folded into first tap
            for dj in range(1, kw):
                # Column shift via XLU lane rotation:
                #   rolled[:, j] = v[:, (j + dj) % ow_pad]
                # Correct for j < ow (since ow + kw - 1 <= ow_pad); wrap garbage
                # only hits padding columns that are discarded on the host.
                rolled = pltpu.roll(v, shift=ow_pad - dj, axis=1)
                acc = acc + rolled * w[di * kw + dj]
            total = acc if total is None else total + acc
        return total

    if top > 0:
        o_ref[0:top, :] = window_sum(xa_ref, top)       # aligned store
    o_ref[top:tm, :] = window_sum(edge_ref, halo)       # aligned store


def _vmem_policy():
    """(tile-sizing budget, compiler vmem limit) in bytes, by chip generation."""
    try:
        kind = jax.devices()[0].device_kind.lower()
    except Exception:
        kind = ""
    if ("v5" in kind) or ("v6" in kind):
        # 128 MiB physical VMEM: bigger tiles -> fewer grid steps, less halo re-DMA.
        return 40 * 1024 * 1024, 64 * 1024 * 1024
    # v7x (64 MiB per TensorCore) and unknown chips: stay conservative.
    return 20 * 1024 * 1024, 32 * 1024 * 1024


def convo2d_forward(x, weight, bias, *, vmem_budget_bytes=None, vmem_limit_bytes=None):
    """Pallas equivalent of Convo2d.forward: corr2d(x, weight) + bias."""
    H, W = x.shape
    kh, kw = weight.shape
    if H < kh or W < kw:
        raise ValueError("input smaller than kernel (negative output size)")
    oh, ow = H - kh + 1, W - kw + 1

    budget_default, limit_default = _vmem_policy()
    vmem_budget_bytes = vmem_budget_bytes or budget_default
    vmem_limit_bytes = vmem_limit_bytes or limit_default

    # ---- lane/sublane-aligned padded geometry (no dead columns) ----
    # c_pad == ow_pad == round_up(W, 128) >= ow + (kw - 1), so the roll-based
    # column shifts are valid and the input carries zero extra padding columns.
    ow_pad = _round_up(W, 128)
    c_pad = ow_pad
    halo = max(8, _round_up(kh - 1, 8))      # sublane-aligned row halo

    # ---- output-row tile size from the VMEM budget ----
    # resident ~= 4B * c_pad * (2*tm [xa dbl-buf] + 2*tm [out dbl-buf]
    #                           + 2*halo [xh dbl-buf] + 2*halo [edge scratch])
    tm = vmem_budget_bytes // (20 * c_pad)
    tm = max(halo, (tm // halo) * halo)
    tm = min(tm, _round_up(oh, halo))
    if oh >= 4 * halo:
        # Force >= 2 row tiles so the "parallel" axis shards across v7x's 2 TCs.
        tm = min(tm, _round_up(_cdiv(oh, 2), halo))

    oh_pad = _round_up(oh, tm)
    n_tiles = oh_pad // tm
    r_pad = oh_pad + halo                    # extra rows so the last tile's halo exists

    est_resident = 4 * c_pad * (4 * tm + 4 * halo) + 8 * c_pad * halo
    if est_resident > vmem_limit_bytes:
        raise ValueError(
            "image too wide for row-only tiling at this VMEM budget; "
            "column tiling would be required")

    xf = x.astype(jnp.float32)
    if xf.shape != (r_pad, c_pad):           # skip the pad pass when already aligned
        xf = jnp.pad(xf, ((0, r_pad - H), (0, c_pad - W)))

    w_flat = weight.reshape(-1).astype(jnp.float32)   # 1-D SMEM (no 2-D SMEM padding)
    b = bias.reshape(-1).astype(jnp.float32)

    m = tm // halo                                     # halo-block stride in block units
    kernel = functools.partial(_corr2d_kernel, kh=kh, kw=kw)

    out_pad = pl.pallas_call(
        kernel,
        out_shape=jax.ShapeDtypeStruct((oh_pad, ow_pad), jnp.float32),
        grid=(n_tiles,),
        in_specs=[
            pl.BlockSpec(memory_space=pltpu.MemorySpace.SMEM),   # flat weights
            pl.BlockSpec(memory_space=pltpu.MemorySpace.SMEM),   # bias
            # main rows of output tile i: x_pad[i*tm : i*tm + tm, :]
            pl.BlockSpec((tm, c_pad), lambda i: (i, 0)),
            # halo rows just below the tile: x_pad[(i+1)*tm : (i+1)*tm + halo, :]
            pl.BlockSpec((halo, c_pad), lambda i: ((i + 1) * m, 0)),
        ],
        out_specs=pl.BlockSpec((tm, ow_pad), lambda i: (i, 0)),
        scratch_shapes=[pltpu.VMEM((2 * halo, c_pad), jnp.float32)],
        compiler_params=pltpu.CompilerParams(
            dimension_semantics=("parallel",),     # independent tiles; megacore on v7x
            vmem_limit_bytes=vmem_limit_bytes,
        ),
    )(w_flat, b, xf, xf)

    if (oh, ow) == (oh_pad, ow_pad):
        return out_pad
    return out_pad[:oh, :ow]


def _reference(x, weight, bias):
    """Pure-JAX reference of corr2d(x, weight) + bias (vectorized)."""
    kh, kw = weight.shape
    oh, ow = x.shape[0] - kh + 1, x.shape[1] - kw + 1
    r = jnp.zeros((oh, ow), jnp.float32)
    for di in range(kh):
        for dj in range(kw):
            r = r + x[di:di + oh, dj:dj + ow] * weight[di, dj]
    return r + bias[0]


if __name__ == "__main__":
    key = jax.random.PRNGKey(0)
    k_w, k_x, k_w2, k_x2 = jax.random.split(key, 4)

    # Deterministic parameter init mirroring the module's __init__:
    #   weight = randn(kernel_size), bias = zeros(1)
    kernel_size = (3, 3)
    weight = jax.random.normal(k_w, kernel_size, dtype=jnp.float32)
    bias = jnp.zeros((1,), dtype=jnp.float32)

    # Case 1: small 2-D image, consistent with corr2d's expected 2-D X.
    x = jax.random.normal(k_x, (16, 16), dtype=jnp.float32)
    out = jax.block_until_ready(convo2d_forward(x, weight, bias))
    ref = _reference(x, weight, bias)
    assert out.shape == ref.shape
    assert jnp.allclose(out, ref, atol=1e-4, rtol=1e-4), float(jnp.max(jnp.abs(out - ref)))

    # Case 2: larger image exercising the multi-tile (2 row tiles) / multi-vreg-wide path.
    weight2 = jax.random.normal(k_w2, kernel_size, dtype=jnp.float32)
    x2 = jax.random.normal(k_x2, (200, 200), dtype=jnp.float32)
    out2 = jax.block_until_ready(convo2d_forward(x2, weight2, bias))
    ref2 = _reference(x2, weight2, bias)
    assert out2.shape == ref2.shape
    assert jnp.allclose(out2, ref2, atol=1e-4, rtol=1e-4), float(jnp.max(jnp.abs(out2 - ref2)))

    print("KERNEL_OK")
</pallas_src>

<mosaic_0001>
module attributes {stable_mosaic.version = 11 : i64} {
  func.func @_corr2d_kernel(%arg0: i32, %arg1: memref<9xf32, #tpu.memory_space<smem>>, %arg2: memref<1xf32, #tpu.memory_space<smem>>, %arg3: memref<16x128xf32, #tpu.memory_space<vmem>>, %arg4: memref<8x128xf32, #tpu.memory_space<vmem>>, %arg5: memref<16x128xf32, #tpu.memory_space<vmem>>, %arg6: memref<16x128xf32, #tpu.memory_space<vmem>>) attributes {dimension_semantics = [#tpu.dimension_semantics<parallel>], iteration_bounds = array<i64: 1>, scalar_prefetch = 0 : i64, scratch_operands = 1 : i64, tpu.core_type = #tpu.core_type<tc>, window_params = [{transform_indices = @transform_0, window_bounds = array<i64: 9>}, {transform_indices = @transform_1, window_bounds = array<i64: 1>}, {transform_indices = @transform_2, window_bounds = array<i64: 16, 128>}, {transform_indices = @transform_3, window_bounds = array<i64: 8, 128>}, {transform_indices = @transform_4, window_bounds = array<i64: 16, 128>}]} {
    %c0 = arith.constant 0 : index
    %0 = memref.load %arg1[%c0] : memref<9xf32, #tpu.memory_space<smem>>
    %c1 = arith.constant 1 : index
    %1 = memref.load %arg1[%c1] : memref<9xf32, #tpu.memory_space<smem>>
    %c2 = arith.constant 2 : index
    %2 = memref.load %arg1[%c2] : memref<9xf32, #tpu.memory_space<smem>>
    %c3 = arith.constant 3 : index
    %3 = memref.load %arg1[%c3] : memref<9xf32, #tpu.memory_space<smem>>
    %c4 = arith.constant 4 : index
    %4 = memref.load %arg1[%c4] : memref<9xf32, #tpu.memory_space<smem>>
    %c5 = arith.constant 5 : index
    %5 = memref.load %arg1[%c5] : memref<9xf32, #tpu.memory_space<smem>>
    %c6 = arith.constant 6 : index
    %6 = memref.load %arg1[%c6] : memref<9xf32, #tpu.memory_space<smem>>
    %c7 = arith.constant 7 : index
    %7 = memref.load %arg1[%c7] : memref<9xf32, #tpu.memory_space<smem>>
    %c8 = arith.constant 8 : index
    %8 = memref.load %arg1[%c8] : memref<9xf32, #tpu.memory_space<smem>>
    %c0_0 = arith.constant 0 : index
    %9 = memref.load %arg2[%c0_0] : memref<1xf32, #tpu.memory_space<smem>>
    %c8_1 = arith.constant 8 : index
    %c0_2 = arith.constant 0 : index
    %10 = vector.load %arg3[%c8_1, %c0_2] : memref<16x128xf32, #tpu.memory_space<vmem>>, vector<8x128xf32>
    %c0_3 = arith.constant 0 : index
    %c0_4 = arith.constant 0 : index
    %11 = vector.load %arg6[%c0_3, %c0_4] : memref<16x128xf32, #tpu.memory_space<vmem>>, vector<8x128xf32>
    tpu.vector_store %arg6[%c0_3, %c0_4], %10 {strides = array<i32>} : memref<16x128xf32, #tpu.memory_space<vmem>>, vector<8x128xf32>,
    %c0_5 = arith.constant 0 : index
    %c0_6 = arith.constant 0 : index
    %12 = vector.load %arg4[%c0_5, %c0_6] : memref<8x128xf32, #tpu.memory_space<vmem>>, vector<8x128xf32>
    %c8_7 = arith.constant 8 : index
    %c0_8 = arith.constant 0 : index
    %13 = vector.load %arg6[%c8_7, %c0_8] : memref<16x128xf32, #tpu.memory_space<vmem>>, vector<8x128xf32>
    tpu.vector_store %arg6[%c8_7, %c0_8], %12 {strides = array<i32>} : memref<16x128xf32, #tpu.memory_space<vmem>>, vector<8x128xf32>,
    %c0_9 = arith.constant 0 : index
    %c0_10 = arith.constant 0 : index
    %14 = vector.load %arg3[%c0_9, %c0_10] : memref<16x128xf32, #tpu.memory_space<vmem>>, vector<8x128xf32>
    %15 = vector.broadcast %0 : f32 to vector<8x128xf32>
    %16 = arith.mulf %14, %15 : vector<8x128xf32>
    %17 = vector.broadcast %9 : f32 to vector<8x128xf32>
    %18 = arith.addf %16, %17 : vector<8x128xf32>
    %c127_i32 = arith.constant 127 : i32
    %19 = tpu.dynamic_rotate %14 by %c127_i32 dim 1 : vector<8x128xf32>, i32 -> vector<8x128xf32>
    %20 = vector.broadcast %1 : f32 to vector<8x128xf32>
    %21 = arith.mulf %19, %20 : vector<8x128xf32>
    %22 = arith.addf %18, %21 : vector<8x128xf32>
    %c126_i32 = arith.constant 126 : i32
    %23 = tpu.dynamic_rotate %14 by %c126_i32 dim 1 : vector<8x128xf32>, i32 -> vector<8x128xf32>
    %24 = vector.broadcast %2 : f32 to vector<8x128xf32>
    %25 = arith.mulf %23, %24 : vector<8x128xf32>
    %26 = arith.addf %22, %25 : vector<8x128xf32>
    %c1_11 = arith.constant 1 : index
    %c0_12 = arith.constant 0 : index
    %27 = vector.load %arg3[%c1_11, %c0_12] : memref<16x128xf32, #tpu.memory_space<vmem>>, vector<8x128xf32>
    %28 = vector.broadcast %3 : f32 to vector<8x128xf32>
    %29 = arith.mulf %27, %28 : vector<8x128xf32>
    %c127_i32_13 = arith.constant 127 : i32
    %30 = tpu.dynamic_rotate %27 by %c127_i32_13 dim 1 : vector<8x128xf32>, i32 -> vector<8x128xf32>
    %31 = vector.broadcast %4 : f32 to vector<8x128xf32>
    %32 = arith.mulf %30, %31 : vector<8x128xf32>
    %33 = arith.addf %29, %32 : vector<8x128xf32>
    %c126_i32_14 = arith.constant 126 : i32
    %34 = tpu.dynamic_rotate %27 by %c126_i32_14 dim 1 : vector<8x128xf32>, i32 -> vector<8x128xf32>
    %35 = vector.broadcast %5 : f32 to vector<8x128xf32>
    %36 = arith.mulf %34, %35 : vector<8x128xf32>
    %37 = arith.addf %33, %36 : vector<8x128xf32>
    %38 = arith.addf %26, %37 : vector<8x128xf32>
    %c2_15 = arith.constant 2 : index
    %c0_16 = arith.constant 0 : index
    %39 = vector.load %arg3[%c2_15, %c0_16] : memref<16x128xf32, #tpu.memory_space<vmem>>, vector<8x128xf32>
    %40 = vector.broadcast %6 : f32 to vector<8x128xf32>
    %41 = arith.mulf %39, %40 : vector<8x128xf32>
    %c127_i32_17 = arith.constant 127 : i32
    %42 = tpu.dynamic_rotate %39 by %c127_i32_17 dim 1 : vector<8x128xf32>, i32 -> vector<8x128xf32>
    %43 = vector.broadcast %7 : f32 to vector<8x128xf32>
    %44 = arith.mulf %42, %43 : vector<8x128xf32>
    %45 = arith.addf %41, %44 : vector<8x128xf32>
    %c126_i32_18 = arith.constant 126 : i32
    %46 = tpu.dynamic_rotate %39 by %c126_i32_18 dim 1 : vector<8x128xf32>, i32 -> vector<8x128xf32>
    %47 = vector.broadcast %8 : f32 to vector<8x128xf32>
    %48 = arith.mulf %46, %47 : vector<8x128xf32>
    %49 = arith.addf %45, %48 : vector<8x128xf32>
    %50 = arith.addf %38, %49 : vector<8x128xf32>
    %c0_19 = arith.constant 0 : index
    %c0_20 = arith.constant 0 : index
    %51 = vector.load %arg5[%c0_19, %c0_20] : memref<16x128xf32, #tpu.memory_space<vmem>>, vector<8x128xf32>
    tpu.vector_store %arg5[%c0_19, %c0_20], %50 {strides = array<i32>} : memref<16x128xf32, #tpu.memory_space<vmem>>, vector<8x128xf32>,
    %c0_21 = arith.constant 0 : index
    %c0_22 = arith.constant 0 : index
    %52 = vector.load %arg6[%c0_21, %c0_22] : memref<16x128xf32, #tpu.memory_space<vmem>>, vector<8x128xf32>
    %53 = vector.broadcast %0 : f32 to vector<8x128xf32>
    %54 = arith.mulf %52, %53 : vector<8x128xf32>
    %55 = vector.broadcast %9 : f32 to vector<8x128xf32>
    %56 = arith.addf %54, %55 : vector<8x128xf32>
    %c127_i32_23 = arith.constant 127 : i32
    %57 = tpu.dynamic_rotate %52 by %c127_i32_23 dim 1 : vector<8x128xf32>, i32 -> vector<8x128xf32>
    %58 = vector.broadcast %1 : f32 to vector<8x128xf32>
    %59 = arith.mulf %57, %58 : vector<8x128xf32>
    %60 = arith.addf %56, %59 : vector<8x128xf32>
    %c126_i32_24 = arith.constant 126 : i32
    %61 = tpu.dynamic_rotate %52 by %c126_i32_24 dim 1 : vector<8x128xf32>, i32 -> vector<8x128xf32>
    %62 = vector.broadcast %2 : f32 to vector<8x128xf32>
    %63 = arith.mulf %61, %62 : vector<8x128xf32>
    %64 = arith.addf %60, %63 : vector<8x128xf32>
    %c1_25 = arith.constant 1 : index
    %c0_26 = arith.constant 0 : index
    %65 = vector.load %arg6[%c1_25, %c0_26] : memref<16x128xf32, #tpu.memory_space<vmem>>, vector<8x128xf32>
    %66 = vector.broadcast %3 : f32 to vector<8x128xf32>
    %67 = arith.mulf %65, %66 : vector<8x128xf32>
    %c127_i32_27 = arith.constant 127 : i32
    %68 = tpu.dynamic_rotate %65 by %c127_i32_27 dim 1 : vector<8x128xf32>, i32 -> vector<8x128xf32>
    %69 = vector.broadcast %4 : f32 to vector<8x128xf32>
    %70 = arith.mulf %68, %69 : vector<8x128xf32>
    %71 = arith.addf %67, %70 : vector<8x128xf32>
    %c126_i32_28 = arith.constant 126 : i32
    %72 = tpu.dynamic_rotate %65 by %c126_i32_28 dim 1 : vector<8x128xf32>, i32 -> vector<8x128xf32>
    %73 = vector.broadcast %5 : f32 to vector<8x128xf32>
    %74 = arith.mulf %72, %73 : vector<8x128xf32>
    %75 = arith.addf %71, %74 : vector<8x128xf32>
    %76 = arith.addf %64, %75 : vector<8x128xf32>
    %c2_29 = arith.constant 2 : index
    %c0_30 = arith.constant 0 : index
    %77 = vector.load %arg6[%c2_29, %c0_30] : memref<16x128xf32, #tpu.memory_space<vmem>>, vector<8x128xf32>
    %78 = vector.broadcast %6 : f32 to vector<8x128xf32>
    %79 = arith.mulf %77, %78 : vector<8x128xf32>
    %c127_i32_31 = arith.constant 127 : i32
    %80 = tpu.dynamic_rotate %77 by %c127_i32_31 dim 1 : vector<8x128xf32>, i32 -> vector<8x128xf32>
    %81 = vector.broadcast %7 : f32 to vector<8x128xf32>
    %82 = arith.mulf %80, %81 : vector<8x128xf32>
    %83 = arith.addf %79, %82 : vector<8x128xf32>
    %c126_i32_32 = arith.constant 126 : i32
    %84 = tpu.dynamic_rotate %77 by %c126_i32_32 dim 1 : vector<8x128xf32>, i32 -> vector<8x128xf32>
    %85 = vector.broadcast %8 : f32 to vector<8x128xf32>
    %86 = arith.mulf %84, %85 : vector<8x128xf32>
    %87 = arith.addf %83, %86 : vector<8x128xf32>
    %88 = arith.addf %76, %87 : vector<8x128xf32>
    %c8_33 = arith.constant 8 : index
    %c0_34 = arith.constant 0 : index
    %89 = vector.load %arg5[%c8_33, %c0_34] : memref<16x128xf32, #tpu.memory_space<vmem>>, vector<8x128xf32>
    tpu.vector_store %arg5[%c8_33, %c0_34], %88 {strides = array<i32>} : memref<16x128xf32, #tpu.memory_space<vmem>>, vector<8x128xf32>,
    return
  }
  func.func @transform_0(%arg0: i32) -> i32 {
    %c0_i32 = arith.constant 0 : i32
    %c0_i32_0 = arith.constant 0 : i32
    return %c0_i32 : i32
  }
  func.func @transform_1(%arg0: i32) -> i32 {
    %c0_i32 = arith.constant 0 : i32
    %c0_i32_0 = arith.constant 0 : i32
    return %c0_i32 : i32
  }
  func.func @transform_2(%arg0: i32) -> (i32, i32) {
    %c0_i32 = arith.constant 0 : i32
    %c0_i32_0 = arith.constant 0 : i32
    return %arg0, %c0_i32 : i32, i32
  }
  func.func @transform_3(%arg0: i32) -> (i32, i32) {
    %c1_i32 = arith.constant 1 : i32
    %0 = arith.addi %arg0, %c1_i32 : i32
    %c2_i32 = arith.constant 2 : i32
    %1 = arith.muli %0, %c2_i32 : i32
    %c0_i32 = arith.constant 0 : i32
    %c0_i32_0 = arith.constant 0 : i32
    return %1, %c0_i32 : i32, i32
  }
  func.func @transform_4(%arg0: i32) -> (i32, i32) {
    %c0_i32 = arith.constant 0 : i32
    %c0_i32_0 = arith.constant 0 : i32
    return %arg0, %c0_i32 : i32, i32
  }
}

</mosaic_0001>

<bundles_post_ra>
// kernel: tpu_custom_call.1
= control target key start
LH: loop header
LB: loop body
LE: loop exit
PB: predicated region body
PF: predicated region fallthrough
CT: control target
= control target key end

     0   :  { %10 = vsyncpa [#allocation7], 0  ;;  %s386_s0 = inlined_call_operand.vmem [shape: f32[9], index: 0, kind: input, shape index: {}]   ;;  %s387_s1 = inlined_call_operand.<no memory space> [shape: f32[1], index: 1, kind: input, shape index: {}]   ;;  %s388_s2 = inlined_call_operand.hbm [shape: f32[24,128], index: 2, kind: input, shape index: {}]   ;;  %s389_s3 = inlined_call_operand.hbm [shape: f32[24,128], index: 3, kind: input, shape index: {}]   ;;  %s390_s4 = inlined_call_operand.hbm [shape: f32[16,128], index: 4, kind: output, shape index: {}]  }
   0x1   :  { %11 = vsyncpa [#allocation5], 0 }
   0x2   :  { %12 = vsyncpa [#allocation10], 0 }
   0x3   :  { %13 = vsyncpa [#allocation6], 0  ;;  %s20_s17 = sshll.u32 %s386_s0, 4  ;;  %s21_s17 = int_to_ptr.vmem [resolvable:$true] %s20_s17 }
   0x4   :  { %s192_s18 = scalar_lea.vmem %s21_s17, 16  ;;  %p197_p1 = scmp.lt.s32.totalorder %s21_s17, %s21_s17 }
   0x5   :  { %p193_p0 = scmp.ne.s32.totalorder %s21_s17, %s192_s18  ;;  %p198_p2 = scmp.lt.s32.totalorder %s192_s18, %s192_s18 }
   0x7   :  { %p199_p3 = por %p198_p2, %p197_p1 }
   0x9   :  { %p200_p4 = pnand %p199_p3, %p193_p0 }
   0xb   :  { %203 = shalt.err (!%p200_p4)
}
   0xc   :  { %s281_s19 = smov [#allocation4]   ;;  %s282_s20 = smov [#allocation8]  }
   0xd   :  { %23 = dma.vmem_to_smem %s21_s17, 16, %s281_s19, [#allocation7]  }
   0xe   :  { %s31_s21 = sshll.u32 %s282_s20, 4  ;;  %s204_s24 = scalar_lea.hbm %s388_s2, 256  ;;  %s32_s21 = int_to_ptr.vmem [resolvable:$true] %s31_s21 }
   0xf   :  { %p205_p5 = scmp.ne.s32.totalorder %s388_s2, %s204_s24  ;;  %s206_s28 = scalar_lea.hbm %s388_s2, 384 }
  0x10   :  { %p207_p6 = scmp.lt.u32.totalorder %s206_s28, %s204_s24  ;;  %p208_p7 = scmp.lt.u32.totalorder %s204_s24, %s388_s2 }
  0x12   :  { %p209_p8 = por %p208_p7, %p207_p6 }
  0x14   :  { %p210_p9 = pnand %p209_p8, %p205_p5 }
  0x16   :  { %213 = shalt.err (!%p210_p9)
}
  0x17   :  { %s214_s5 = scalar_lea.vmem %s32_s21, 256  ;;  %p219_p11 = scmp.lt.s32.totalorder %s32_s21, %s32_s21 }
  0x18   :  { %p215_p10 = scmp.ne.s32.totalorder %s32_s21, %s214_s5  ;;  %p220_p12 = scmp.lt.s32.totalorder %s214_s5, %s214_s5 }
  0x1a   :  { %p221_p13 = por %p220_p12, %p219_p11 }
  0x1c   :  { %p222_p0 = pnand %p221_p13, %p215_p10 }
  0x1e   :  { %225 = shalt.err (!%p222_p0)
}
  0x1f   :  { %s283_s6 = smov 128   ;;  %s284_s7 = smov 8  }
  0x20   :  { %37 = dma.hbm_to_vmem [thread:$0]  %s388_s2, 256, %s32_s21, [#allocation5], %s283_s6, %s283_s6, %s284_s7  }
  0x21   :  { %s175_s12 = scalar_lea.hbm %s389_s3, 256  ;;  %s285_s13 = smov [#allocation9]  }
  0x22   :  { %s48_s14 = sshll.u32 %s285_s13, 4  ;;  %s250_s17 = scalar_lea.hbm %s389_s3, 384  ;;  %s49_s14 = int_to_ptr.vmem [resolvable:$true] %s48_s14 }
  0x23   :  { %p227_p1 = scmp.ne.s32.totalorder %s175_s12, %s250_s17  ;;  %p229_p2 = scmp.lt.u32.totalorder %s175_s12, %s389_s3 }
  0x24   :  { %p230_p3 = scmp.lt.u32.totalorder %s250_s17, %s250_s17  ;;  %p232_p5 = scmp.lt.u32.totalorder %s250_s17, %s175_s12 }
  0x26   :  { %p231_p4 = por %p230_p3, %p229_p2 }
  0x28   :  { %p233_p6 = por %p232_p5, %p231_p4 }
  0x2a   :  { %p234_p7 = pnand %p233_p6, %p227_p1 }
  0x2c   :  { %237 = shalt.err (!%p234_p7)
}
  0x2d   :  { %s238_s2 = scalar_lea.vmem %s49_s14, 128  ;;  %p243_p9 = scmp.lt.s32.totalorder %s49_s14, %s49_s14 }
  0x2e   :  { %p239_p8 = scmp.ne.s32.totalorder %s49_s14, %s238_s2  ;;  %p244_p10 = scmp.lt.s32.totalorder %s238_s2, %s238_s2 }
  0x30   :  { %p245_p11 = por %p244_p10, %p243_p9 }
  0x32   :  { %p246_p12 = pnand %p245_p11, %p239_p8 }
  0x34   :  { %249 = shalt.err (!%p246_p12)
}
  0x35   :  { %51 = dma.hbm_to_vmem [thread:$0]  %s175_s12, 128, %s49_s14, [#allocation10]  }
  0x36   :  { %273 = dma.done.wait [#allocation7], 16  }
  0x37   :  { %274 = vsyncadd [#allocation7], 4294967280 }
  0x38   :  { %275 = dma.done.wait [#allocation5], 256  }
  0x39   :  { %276 = vsyncadd [#allocation5], 4294967040 }
  0x3a   :  { %277 = dma.done.wait [#allocation10], 128  }
  0x3b   :  { %278 = vsyncadd [#allocation10], 4294967168 }
  0x3c   :  { %61 = sfence }
  0x3d   :  { %v78_v0 = vld [vmem:[#allocation8] sm:$0xff]  ;;  %v74_v2 = vld [vmem:[#allocation8 + $0x8] sm:$0xff]  ;;  %s286_s3 = smov 127   ;;  %v76_v3 = vld [vmem:[#allocation9] sm:$0xff]  ;;  %s287_s20 = smov 126   ;;  %v81_v12 = vstv %s387_s1 }
  0x3e   :  { %v93_v1 = vld [vmem:[#allocation8 + $0x1] sm:$0xff]  ;;  %83 = vrot.lane.b32.xlu0 %v78_v0, %s286_s3  ;;  %75 = vst [vmem:[#allocation2] sm:$0xff] %v74_v2  ;;  %77 = vst [vmem:[#allocation2 + $0x8] sm:$0xff] %v76_v3  ;;  %s64_s21 = sld [smem:[#allocation4]]  ;;  %s344_s22 = sld [smem:[#allocation4 + $0x3]] }
  0x3f   :  { %101 = vrot.lane.b32.xlu1 %v93_v1, %s287_s20  ;;  %v107_v5 = vld [vmem:[#allocation8 + $0x2] sm:$0xff]  ;;  %s346_s23 = sld [smem:[#allocation4 + $0x1]]  ;;  %s348_s24 = sld [smem:[#allocation4 + $0x4]] }
  0x40   :  { %s350_s25 = sld [smem:[#allocation4 + $0x5]]  ;;  %s352_s26 = sld [smem:[#allocation4 + $0x2]] }
  0x41   :  { %s360_s28 = sld [smem:[#allocation4 + $0x6]]  ;;  %s364_s29 = sld [smem:[#allocation4 + $0x7]] }
  0x42   :  { %96 = vrot.lane.b32.xlu0 %v93_v1, %s286_s3  ;;  %s366_s1 = sld [smem:[#allocation4 + $0x8]]  ;;  %s288_s30 = smov [#allocation11]  }
  0x43   :  { %125 = vrot.lane.b32.xlu1 %v74_v2, %s286_s3  ;;  %s161_s5 = sshll.u32 %s288_s30, 4  ;;  %s162_s5 = int_to_ptr.vmem [resolvable:$true] %s161_s5 }
  0x44   :  { %v79_v7 = vstv %s64_s21  ;;  %v94_v8 = vstv %s344_s22  ;;  %s251_s8 = scalar_lea.vmem %s162_s5, 256  ;;  %p256_p0 = scmp.lt.s32.totalorder %s162_s5, %s162_s5 }
  0x45   :  { %v133_v4 = vld [vmem:[#allocation2 + $0x1] sm:$0xff]  ;;  %v80_v10 = vmul.f32 %v79_v7, %v78_v0  ;;  %v85_v13 = vstv %s346_s23  ;;  %v98_v14 = vstv %s348_s24  ;;  %v95_v15 = vmul.f32 %v94_v8, %v93_v1  ;;  %p252_p13 = scmp.ne.s32.totalorder %s162_s5, %s251_s8  ;;  %p257_p1 = scmp.lt.s32.totalorder %s251_s8, %s251_s8 }
  0x46   :  { %88 = vrot.lane.b32.xlu0 %v78_v0, %s287_s20  ;;  %v144_v6 = vld [vmem:[#allocation2 + $0x2] sm:$0xff]  ;;  %v103_v21 = vstv %s350_s25  ;;  %v90_v22 = vstv %s352_s26  ;;  %v123_v25 = vmul.f32 %v79_v7, %v74_v2  ;;  %v134_v33 = vmul.f32 %v133_v4, %v94_v8 }
  0x47   :  { %135 = vrot.lane.b32.xlu1 %v133_v4, %s286_s3  ;;  %v82_v17 = vadd.f32 %v81_v12, %v80_v10  ;;  %v108_v32 = vstv %s360_s28  ;;  %v112_v40 = vstv %s364_s29  ;;  %p258_p2 = por %p257_p1, %p256_p0 }
  0x48   :  { %v124_v35 = vadd.f32 %v123_v25, %v81_v12  ;;  %v109_v42 = vmul.f32 %v108_v32, %v107_v5  ;;  %v145_v49 = vmul.f32 %v144_v6, %v108_v32  ;;  %v117_v50 = vstv %s366_s1 }
  0x49   :  { %p259_p3 = pnand %p258_p2, %p252_p13 }
  0x4a   :  { %110 = vrot.lane.b32.xlu0 %v107_v5, %s286_s3 }
  0x4b   :  { %129 = vrot.lane.b32.xlu1 %v74_v2, %s287_s20 }
  0x4e   :  { %139 = vrot.lane.b32.xlu0 %v133_v4, %s287_s20 }
  0x4f   :  { %146 = vrot.lane.b32.xlu1 %v144_v6, %s286_s3 }
  0x52   :  { %115 = vrot.lane.b32.xlu0 %v107_v5, %s287_s20 }
  0x53   :  { %150 = vrot.lane.b32.xlu1 %v144_v6, %s287_s20 }
  0xb0   :  { %v84_v9 = vpop.permute.xlu0 %83 }
  0xb1   :  { %v102_v11 = vpop.permute.xlu1 %101  ;;  %v86_v18 = vmul.f32 %v85_v13, %v84_v9 }
  0xb2   :  { %v104_v27 = vmul.f32 %v103_v21, %v102_v11 }
  0xb3   :  { %v87_v26 = vadd.f32 %v86_v18, %v82_v17 }
  0xb4   :  { %v97_v16 = vpop.permute.xlu0 %96 }
  0xb5   :  { %v99_v19 = vmul.f32 %v98_v14, %v97_v16  ;;  %v126_v20 = vpop.permute.xlu1 %125 }
  0xb6   :  { %v127_v36 = vmul.f32 %v126_v20, %v85_v13 }
  0xb7   :  { %v100_v23 = vadd.f32 %v99_v19, %v95_v15 }
  0xb8   :  { %v89_v24 = vpop.permute.xlu0 %88  ;;  %v128_v44 = vadd.f32 %v127_v36, %v124_v35 }
  0xb9   :  { %v91_v28 = vmul.f32 %v90_v22, %v89_v24  ;;  %v136_v29 = vpop.permute.xlu1 %135  ;;  %v105_v30 = vadd.f32 %v104_v27, %v100_v23 }
  0xba   :  { %v137_v37 = vmul.f32 %v136_v29, %v98_v14 }
  0xbb   :  { %v92_v31 = vadd.f32 %v91_v28, %v87_v26 }
  0xbc   :  { %v111_v34 = vpop.permute.xlu0 %110  ;;  %v138_v46 = vadd.f32 %v137_v37, %v134_v33 }
  0xbd   :  { %v130_v38 = vpop.permute.xlu1 %129  ;;  %v106_v39 = vadd.f32 %v105_v30, %v92_v31  ;;  %v113_v45 = vmul.f32 %v112_v40, %v111_v34 }
  0xbe   :  { %v131_v41 = vmul.f32 %v130_v38, %v90_v22 }
  0xbf   :  { %v114_v55 = vadd.f32 %v113_v45, %v109_v42 }
  0xc0   :  { %v140_v43 = vpop.permute.xlu0 %139  ;;  %v132_v53 = vadd.f32 %v131_v41, %v128_v44 }
  0xc1   :  { %v141_v47 = vmul.f32 %v140_v43, %v103_v21  ;;  %v147_v48 = vpop.permute.xlu1 %146 }
  0xc2   :  { %v148_v51 = vmul.f32 %v147_v48, %v112_v40 }
  0xc3   :  { %v142_v52 = vadd.f32 %v141_v47, %v138_v46 }
  0xc4   :  { %v116_v54 = vpop.permute.xlu0 %115  ;;  %v149_v59 = vadd.f32 %v148_v51, %v145_v49 }
  0xc5   :  { %v118_v56 = vmul.f32 %v117_v50, %v116_v54  ;;  %v151_v57 = vpop.permute.xlu1 %150  ;;  %v143_v58 = vadd.f32 %v142_v52, %v132_v53 }
  0xc6   :  { %v152_v60 = vmul.f32 %v151_v57, %v117_v50 }
  0xc7   :  { %v119_v61 = vadd.f32 %v118_v56, %v114_v55 }
  0xc8   :  { %v153_v62 = vadd.f32 %v152_v60, %v149_v59 }
  0xc9   :  { %v120_v63 = vadd.f32 %v119_v61, %v106_v39 }
  0xca   :  { %v154_v0 = vadd.f32 %v153_v62, %v143_v58 }
  0xcb   :  { %121 = vst [vmem:[#allocation11] sm:$0xff] %v120_v63 }
  0xcc   :  { %155 = vst [vmem:[#allocation11 + $0x8] sm:$0xff] %v154_v0 }
  0xcd   :  { %262 = shalt.err (!%p259_p3)
}
  0xce   :  { %s263_s11 = scalar_lea.hbm %s390_s4, 256 }
  0xcf   :  { %p264_p4 = scmp.ne.s32.totalorder %s390_s4, %s263_s11  ;;  %p267_p5 = scmp.lt.u32.totalorder %s263_s11, %s390_s4 }
  0xd1   :  { %p269_p6 = pnand %p267_p5, %p264_p4 }
  0xd3   :  { %272 = shalt.err (!%p269_p6)
}
  0xd4   :  { %167 = dma.vmem_to_hbm [thread:$0]  %s162_s5, 256, %s390_s4, [#allocation6], %s283_s6, %s283_s6, %s284_s7  }
  0xd5   :  { %279 = dma.done.wait [#allocation6], 256  }
  0xd6   :  { %280 = vsyncadd [#allocation6], 4294967040 }
  0xd7   :  { %171 = vsyncpa [#allocation5], 1 }
  0xd8   :  { %172 = vsyncpa [#allocation10], 1 }
  0xd9   :  { %173 = vsyncpa [#allocation6], 1 }
  0xda   :  { %174 = vsyncpa [#allocation7], 1 }

</bundles_post_ra>
